<compile_context>
chip_gen: v7x
topology: tpu7x:2x2x1
jax: 0.10.0
libtpu: 0.0.40
codegen_flags: <defaults>
</compile_context>

<pallas_src>
import functools

import jax
import jax.numpy as jnp
from jax.experimental import pallas as pl
from jax.experimental.pallas import tpu as pltpu

ALPHA = 0.25
GAMMA = 2.0              # hard-coded below as an explicit square
LANE = 128


def _focal_kernel(x_ref, y_ref, out_ref, acc_ref, *,
                  n_valid, steps, block_rows, approx_recip):
    c = pl.program_id(0)          # core-split axis (CORE_PARALLEL on v7x)
    i = pl.program_id(1)          # sequential reduction axis

    @pl.when(i == 0)
    def _():
        acc_ref[...] = jnp.zeros_like(acc_ref)

    x = x_ref[...].astype(jnp.float32)      # logits (native dtype on the wire)
    y = y_ref[...]                          # labels stay integer on the wire
    if jnp.issubdtype(y.dtype, jnp.floating):
        is_pos = y == 1.0
    else:
        # Widen in-register for a layout-friendly compare; no f32 label math.
        is_pos = y.astype(jnp.int32) == 1

    # Stable focal-loss math: t = x for positives, -x for negatives, so
    # pt = sigmoid(t), 1-pt = sigmoid(-t), ce = -log(sigmoid(t)).
    negx = -x
    z = jnp.exp(jnp.minimum(x, negx))                       # exp(-|x|): the only exp
    ce = jnp.maximum(jnp.where(is_pos, negx, x), 0.0) + jnp.log1p(z)
    r = pl.reciprocal(1.0 + z, approx=approx_recip)         # EUP slot on v7x
    t_nonneg = jnp.where(is_pos, x, negx) >= 0.0
    one_minus_pt = jnp.where(t_nonneg, z, 1.0) * r
    alpha = jnp.where(is_pos, ALPHA, 1.0 - ALPHA)
    loss = alpha * (one_minus_pt * one_minus_pt) * ce       # gamma == 2

    blk = c * steps + i
    block_elems = block_rows * LANE
    block_start = blk * block_elems
    block_end = block_start + block_elems

    # Fast path: fully-valid block -> sublane-fold and accumulate one row.
    @pl.when(block_end <= n_valid)
    def _():
        acc_ref[0:1, :] = acc_ref[0:1, :] + jnp.sum(loss, axis=0, keepdims=True)

    # Slow path: block overlaps the ragged tail or is a phantom (core-split
    # overshoot) block -> mask element-wise against the valid element count.
    @pl.when(block_end > n_valid)
    def _():
        ridx = jax.lax.broadcasted_iota(jnp.int32, (block_rows, LANE), 0)
        cidx = jax.lax.broadcasted_iota(jnp.int32, (block_rows, LANE), 1)
        gidx = block_start + ridx * LANE + cidx
        masked = jnp.where(gidx < n_valid, loss, 0.0)
        acc_ref[0:1, :] = acc_ref[0:1, :] + jnp.sum(masked, axis=0, keepdims=True)

    @pl.when(i == pl.num_programs(1) - 1)
    def _():
        # Lane-dense (8,128) store; only row 0 is non-zero.
        out_ref[...] = acc_ref[...]


def _tpu_config():
    """Best-effort generation detection -> (num_cores, max_block_rows, core_sem, approx)."""
    gen = None
    try:
        kind = jax.devices()[0].device_kind.lower()
        for g in ("7", "6", "5", "4", "3", "2"):
            if g in kind:
                gen = int(g)
                break
    except Exception:
        gen = None
    if gen is not None and gen >= 7:
        # v7x: 2 TCs, 64 MiB VMEM/TC; 8192-row f32 tiles keep double-buffered
        # inputs <= ~16 MiB. Approx reciprocal rides the EUP (VALU-bound there).
        return 2, 8192, pltpu.CORE_PARALLEL, True
    if gen == 6:
        return 1, 8192, pltpu.ARBITRARY, False
    # v5e and older / unknown: 16 MiB default scoped VMEM -> smaller tiles.
    return 1, 4096, pltpu.ARBITRARY, False


def _focal_tail_sum(x, y):
    """Pure-JAX sum of the focal loss for a tiny (<128-element) ragged tail."""
    x = x.astype(jnp.float32)
    if jnp.issubdtype(y.dtype, jnp.floating):
        is_pos = y == 1.0
    else:
        is_pos = y == 1
    negx = -x
    z = jnp.exp(jnp.minimum(x, negx))
    ce = jnp.maximum(jnp.where(is_pos, negx, x), 0.0) + jnp.log1p(z)
    one_minus_pt = jnp.where(jnp.where(is_pos, x, negx) >= 0.0, z, 1.0) / (1.0 + z)
    alpha = jnp.where(is_pos, ALPHA, 1.0 - ALPHA)
    return jnp.sum(alpha * one_minus_pt * one_minus_pt * ce, dtype=jnp.float32)


def focal_loss_v1(logits, label, reduction="mean"):
    """JAX/Pallas equivalent of FocalLossV1.forward (alpha=0.25, gamma=2)."""
    assert logits.shape == label.shape
    if reduction not in ("mean", "sum"):
        # TODO(synk): reduction='none' would need the per-element loss tensor as
        # a kernel output; only 'mean'/'sum' are reduced in-kernel here.
        raise NotImplementedError("only 'mean' and 'sum' reductions supported")

    n_elems = logits.size
    x_flat = logits.reshape(-1)
    y_flat = label.reshape(-1)
    if y_flat.dtype == jnp.bool_:
        y_flat = y_flat.astype(jnp.int8)   # same 1 B/elem; plain int compare in-kernel
    # NOTE: callers should supply int8/bool labels to halve label HBM traffic;
    # wider integer labels are streamed as-is (no extra conversion pass).

    main_elems = (n_elems // LANE) * LANE      # copy-free reshape boundary
    tail_elems = n_elems - main_elems

    total = jnp.float32(0.0)

    if main_elems > 0:
        rows = main_elems // LANE
        x2 = x_flat[:main_elems].reshape(rows, LANE)
        y2 = y_flat[:main_elems].reshape(rows, LANE)

        num_cores, max_block_rows, core_sem, approx_recip = _tpu_config()
        block_rows = rows if rows <= max_block_rows else max_block_rows
        num_blocks = pl.cdiv(rows, block_rows)
        if num_blocks < num_cores:
            num_cores, core_sem = 1, pltpu.ARBITRARY

        def run(n_cores, c_sem):
            steps = pl.cdiv(num_blocks, n_cores)

            def in_map(c, i):
                # Clamp phantom (core-split overshoot) blocks onto the last real
                # block; their contribution is masked to zero inside the kernel.
                return (jnp.minimum(c * steps + i, num_blocks - 1), 0)

            kernel = functools.partial(
                _focal_kernel, n_valid=main_elems, steps=steps,
                block_rows=block_rows, approx_recip=approx_recip)

            per_step = block_rows * LANE * (x2.dtype.itemsize + y2.dtype.itemsize)
            vmem_limit = int(min(max(4 * per_step + (8 << 20), 16 << 20), 40 << 20))

            return pl.pallas_call(
                kernel,
                out_shape=jax.ShapeDtypeStruct((n_cores * 8, LANE), jnp.float32),
                grid_spec=pltpu.PrefetchScalarGridSpec(
                    num_scalar_prefetch=0,
                    grid=(n_cores, steps),
                    in_specs=[pl.BlockSpec((block_rows, LANE), in_map),
                              pl.BlockSpec((block_rows, LANE), in_map)],
                    out_specs=pl.BlockSpec((8, LANE), lambda c, i: (c, 0)),
                    scratch_shapes=[pltpu.VMEM((8, LANE), jnp.float32)],
                ),
                compiler_params=pltpu.CompilerParams(
                    dimension_semantics=(c_sem, pltpu.ARBITRARY),
                    vmem_limit_bytes=vmem_limit),
            )(x2, y2)

        try:
            partials = run(num_cores, core_sem)
        except Exception:
            # Conservative fallback (e.g. CORE_PARALLEL unsupported): single core.
            partials = run(1, pltpu.ARBITRARY)

        total = total + jnp.sum(partials)

    if tail_elems > 0:
        total = total + _focal_tail_sum(x_flat[main_elems:], y_flat[main_elems:])

    if reduction == "mean":
        return total / jnp.float32(n_elems)
    return total


def _focal_loss_ref(logits, label):
    """Pure-JAX reference mirroring the PyTorch module (reduction='mean')."""
    logits = logits.astype(jnp.float32)
    labelf = label.astype(jnp.float32)
    alpha = jnp.where(labelf == 1.0, ALPHA, 1.0 - ALPHA)
    probs = jax.nn.sigmoid(logits)
    pt = jnp.where(labelf == 1.0, probs, 1.0 - probs)
    ce = jnp.maximum(logits, 0.0) - logits * labelf + jnp.log1p(
        jnp.exp(-jnp.abs(logits)))
    loss = alpha * jnp.power(1.0 - pt, GAMMA) * ce
    return loss.mean()


if __name__ == "__main__":
    key = jax.random.PRNGKey(0)
    k1, k2 = jax.random.split(key)

    # Small NCHW-like shapes, consistent with "(N, ...)" in the module.
    shape = (2, 4, 16, 16)
    logits = jax.random.normal(k1, shape, dtype=jnp.float32) * 2.0
    # Producer-side narrow labels (int8) keep the kernel's HBM traffic low.
    label = jax.random.bernoulli(k2, p=0.3, shape=shape).astype(jnp.int8)

    out = focal_loss_v1(logits, label, reduction="mean")
    out = jax.block_until_ready(out)

    ref = _focal_loss_ref(logits, label)
    assert jnp.allclose(out, ref, rtol=2e-4, atol=1e-6), (out, ref)

    print("KERNEL_OK")
</pallas_src>

<mosaic_0001>
module attributes {stable_mosaic.version = 11 : i64} {
  func.func @_focal_kernel(%arg0: i32, %arg1: i32, %arg2: memref<16x128xf32, #tpu.memory_space<vmem>>, %arg3: memref<16x128xi8, #tpu.memory_space<vmem>>, %arg4: memref<8x128xf32, #tpu.memory_space<vmem>>, %arg5: memref<8x128xf32, #tpu.memory_space<vmem>>) attributes {dimension_semantics = [#tpu.dimension_semantics<arbitrary>, #tpu.dimension_semantics<arbitrary>], iteration_bounds = array<i64: 1, 1>, scalar_prefetch = 0 : i64, scratch_operands = 1 : i64, tpu.core_type = #tpu.core_type<tc>, window_params = [{transform_indices = @transform_0, window_bounds = array<i64: 16, 128>}, {transform_indices = @transform_1, window_bounds = array<i64: 16, 128>}, {transform_indices = @transform_2, window_bounds = array<i64: 8, 128>}]} {
    %c0_i32 = arith.constant 0 : i32
    %0 = arith.cmpi eq, %arg1, %c0_i32 : i32
    %1 = arith.extui %0 : i1 to i32
    %c0_i32_0 = arith.constant 0 : i32
    %2 = arith.cmpi ne, %1, %c0_i32_0 : i32
    scf.if %2 {
      %cst_18 = arith.constant 0.000000e+00 : f32
      %45 = vector.broadcast %cst_18 : f32 to vector<8x128xf32>
      %c0_19 = arith.constant 0 : index
      %c0_20 = arith.constant 0 : index
      %46 = vector.load %arg5[%c0_19, %c0_20] : memref<8x128xf32, #tpu.memory_space<vmem>>, vector<8x128xf32>
      tpu.vector_store %arg5[%c0_19, %c0_20], %45 {strides = array<i32>} : memref<8x128xf32, #tpu.memory_space<vmem>>, vector<8x128xf32>,
    } else {
    }
    %c0 = arith.constant 0 : index
    %c0_1 = arith.constant 0 : index
    %3 = vector.load %arg2[%c0, %c0_1] : memref<16x128xf32, #tpu.memory_space<vmem>>, vector<16x128xf32>
    %c0_2 = arith.constant 0 : index
    %c0_3 = arith.constant 0 : index
    %4 = vector.load %arg3[%c0_2, %c0_3] : memref<16x128xi8, #tpu.memory_space<vmem>>, vector<16x128xi8>
    %5 = arith.extsi %4 : vector<16x128xi8> to vector<16x128xi32>
    %c1_i32 = arith.constant 1 : i32
    %6 = vector.broadcast %c1_i32 : i32 to vector<16x128xi32>
    %7 = arith.cmpi eq, %5, %6 : vector<16x128xi32>
    %cst = arith.constant 0.000000e+00 : f32
    %8 = vector.broadcast %cst : f32 to vector<16x128xf32>
    %9 = arith.subf %8, %3 : vector<16x128xf32>
    %10 = arith.minimumf %3, %9 : vector<16x128xf32>
    %11 = math.exp %10 : vector<16x128xf32>
    %12 = arith.select %7, %9, %3 : vector<16x128xi1>, vector<16x128xf32>
    %cst_4 = arith.constant 0.000000e+00 : f32
    %13 = vector.broadcast %cst_4 : f32 to vector<16x128xf32>
    %14 = arith.maximumf %12, %13 : vector<16x128xf32>
    %15 = math.log1p %11 : vector<16x128xf32>
    %16 = arith.addf %14, %15 : vector<16x128xf32>
    %cst_5 = arith.constant 1.000000e+00 : f32
    %17 = vector.broadcast %cst_5 : f32 to vector<16x128xf32>
    %18 = arith.addf %17, %11 : vector<16x128xf32>
    %19 = tpu.reciprocal %18 : vector<16x128xf32> -> vector<16x128xf32>
    %20 = arith.select %7, %3, %9 : vector<16x128xi1>, vector<16x128xf32>
    %cst_6 = arith.constant 0.000000e+00 : f32
    %21 = vector.broadcast %cst_6 : f32 to vector<16x128xf32>
    %22 = arith.cmpf oge, %20, %21 : vector<16x128xf32>
    %cst_7 = arith.constant 1.000000e+00 : f32
    %23 = vector.broadcast %cst_7 : f32 to vector<16x128xf32>
    %24 = arith.select %22, %11, %23 : vector<16x128xi1>, vector<16x128xf32>
    %25 = arith.mulf %24, %19 : vector<16x128xf32>
    %cst_8 = arith.constant 2.500000e-01 : f32
    %cst_9 = arith.constant 7.500000e-01 : f32
    %26 = vector.broadcast %cst_8 : f32 to vector<16x128xf32>
    %27 = vector.broadcast %cst_9 : f32 to vector<16x128xf32>
    %28 = arith.select %7, %26, %27 : vector<16x128xi1>, vector<16x128xf32>
    %29 = arith.mulf %25, %25 : vector<16x128xf32>
    %30 = arith.mulf %28, %29 : vector<16x128xf32>
    %31 = arith.mulf %30, %16 : vector<16x128xf32>
    %c1_i32_10 = arith.constant 1 : i32
    %32 = arith.muli %arg0, %c1_i32_10 : i32
    %33 = arith.addi %32, %arg1 : i32
    %c2048_i32 = arith.constant 2048 : i32
    %34 = arith.muli %33, %c2048_i32 : i32
    %c2048_i32_11 = arith.constant 2048 : i32
    %35 = arith.addi %34, %c2048_i32_11 : i32
    %c2048_i32_12 = arith.constant 2048 : i32
    %36 = arith.cmpi sle, %35, %c2048_i32_12 : i32
    %37 = arith.extui %36 : i1 to i32
    %c0_i32_13 = arith.constant 0 : i32
    %38 = arith.cmpi ne, %37, %c0_i32_13 : i32
    scf.if %38 {
      %c0_18 = arith.constant 0 : index
      %c0_19 = arith.constant 0 : index
      %45 = vector.load %arg5[%c0_18, %c0_19] : memref<8x128xf32, #tpu.memory_space<vmem>>, vector<1x128xf32>
      %cst_20 = arith.constant dense<0.000000e+00> : vector<128xf32>
      %46 = vector.multi_reduction <add>, %31, %cst_20 [0] : vector<16x128xf32> to vector<128xf32>
      %47 = vector.shape_cast %46 : vector<128xf32> to vector<1x128xf32>
      %48 = arith.addf %45, %47 : vector<1x128xf32>
      %c0_21 = arith.constant 0 : index
      %c0_22 = arith.constant 0 : index
      %49 = vector.load %arg5[%c0_21, %c0_22] : memref<8x128xf32, #tpu.memory_space<vmem>>, vector<1x128xf32>
      tpu.vector_store %arg5[%c0_21, %c0_22], %48 {strides = array<i32>} : memref<8x128xf32, #tpu.memory_space<vmem>>, vector<1x128xf32>,
    } else {
    }
    %c2048_i32_14 = arith.constant 2048 : i32
    %39 = arith.cmpi sgt, %35, %c2048_i32_14 : i32
    %40 = arith.extui %39 : i1 to i32
    %c0_i32_15 = arith.constant 0 : i32
    %41 = arith.cmpi ne, %40, %c0_i32_15 : i32
    scf.if %41 {
      %45 = tpu.iota {dimensions = array<i32: 0>} : vector<16x128xi32>
      %46 = tpu.iota {dimensions = array<i32: 1>} : vector<16x128xi32>
      %c128_i32 = arith.constant 128 : i32
      %47 = vector.broadcast %c128_i32 : i32 to vector<16x128xi32>
      %48 = arith.muli %45, %47 : vector<16x128xi32>
      %49 = vector.broadcast %34 : i32 to vector<16x128xi32>
      %50 = arith.addi %49, %48 : vector<16x128xi32>
      %51 = arith.addi %50, %46 : vector<16x128xi32>
      %c2048_i32_18 = arith.constant 2048 : i32
      %52 = vector.broadcast %c2048_i32_18 : i32 to vector<16x128xi32>
      %53 = arith.cmpi slt, %51, %52 : vector<16x128xi32>
      %cst_19 = arith.constant 0.000000e+00 : f32
      %54 = vector.broadcast %cst_19 : f32 to vector<16x128xf32>
      %55 = arith.select %53, %31, %54 : vector<16x128xi1>, vector<16x128xf32>
      %c0_20 = arith.constant 0 : index
      %c0_21 = arith.constant 0 : index
      %56 = vector.load %arg5[%c0_20, %c0_21] : memref<8x128xf32, #tpu.memory_space<vmem>>, vector<1x128xf32>
      %cst_22 = arith.constant dense<0.000000e+00> : vector<128xf32>
      %57 = vector.multi_reduction <add>, %55, %cst_22 [0] : vector<16x128xf32> to vector<128xf32>
      %58 = vector.shape_cast %57 : vector<128xf32> to vector<1x128xf32>
      %59 = arith.addf %56, %58 : vector<1x128xf32>
      %c0_23 = arith.constant 0 : index
      %c0_24 = arith.constant 0 : index
      %60 = vector.load %arg5[%c0_23, %c0_24] : memref<8x128xf32, #tpu.memory_space<vmem>>, vector<1x128xf32>
      tpu.vector_store %arg5[%c0_23, %c0_24], %59 {strides = array<i32>} : memref<8x128xf32, #tpu.memory_space<vmem>>, vector<1x128xf32>,
    } else {
    }
    %c0_i32_16 = arith.constant 0 : i32
    %42 = arith.cmpi eq, %arg1, %c0_i32_16 : i32
    %43 = arith.extui %42 : i1 to i32
    %c0_i32_17 = arith.constant 0 : i32
    %44 = arith.cmpi ne, %43, %c0_i32_17 : i32
    scf.if %44 {
      %c0_18 = arith.constant 0 : index
      %c0_19 = arith.constant 0 : index
      %45 = vector.load %arg5[%c0_18, %c0_19] : memref<8x128xf32, #tpu.memory_space<vmem>>, vector<8x128xf32>
      %c0_20 = arith.constant 0 : index
      %c0_21 = arith.constant 0 : index
      %46 = vector.load %arg4[%c0_20, %c0_21] : memref<8x128xf32, #tpu.memory_space<vmem>>, vector<8x128xf32>
      tpu.vector_store %arg4[%c0_20, %c0_21], %45 {strides = array<i32>} : memref<8x128xf32, #tpu.memory_space<vmem>>, vector<8x128xf32>,
    } else {
    }
    return
  }
  func.func @transform_0(%arg0: i32, %arg1: i32) -> (i32, i32) {
    %c1_i32 = arith.constant 1 : i32
    %0 = arith.muli %arg0, %c1_i32 : i32
    %1 = arith.addi %0, %arg1 : i32
    %c0_i32 = arith.constant 0 : i32
    %2 = arith.minsi %1, %c0_i32 : i32
    %c0_i32_0 = arith.constant 0 : i32
    %c0_i32_1 = arith.constant 0 : i32
    return %2, %c0_i32_0 : i32, i32
  }
  func.func @transform_1(%arg0: i32, %arg1: i32) -> (i32, i32) {
    %c1_i32 = arith.constant 1 : i32
    %0 = arith.muli %arg0, %c1_i32 : i32
    %1 = arith.addi %0, %arg1 : i32
    %c0_i32 = arith.constant 0 : i32
    %2 = arith.minsi %1, %c0_i32 : i32
    %c0_i32_0 = arith.constant 0 : i32
    %c0_i32_1 = arith.constant 0 : i32
    return %2, %c0_i32_0 : i32, i32
  }
  func.func @transform_2(%arg0: i32, %arg1: i32) -> (i32, i32) {
    %c0_i32 = arith.constant 0 : i32
    %c0_i32_0 = arith.constant 0 : i32
    return %arg0, %c0_i32 : i32, i32
  }
}

module attributes {stable_mosaic.version = 11 : i64} {
  func.func @_focal_kernel(%arg0: i32, %arg1: i32, %arg2: memref<16x128xf32, #tpu.memory_space<vmem>>, %arg3: memref<16x128xi8, #tpu.memory_space<vmem>>, %arg4: memref<8x128xf32, #tpu.memory_space<vmem>>, %arg5: memref<8x128xf32, #tpu.memory_space<vmem>>) attributes {dimension_semantics = [#tpu.dimension_semantics<arbitrary>, #tpu.dimension_semantics<arbitrary>], iteration_bounds = array<i64: 1, 1>, scalar_prefetch = 0 : i64, scratch_operands = 1 : i64, tpu.core_type = #tpu.core_type<tc>, window_params = [{transform_indices = @transform_0, window_bounds = array<i64: 16, 128>}, {transform_indices = @transform_1, window_bounds = array<i64: 16, 128>}, {transform_indices = @transform_2, window_bounds = array<i64: 8, 128>}]} {
    %c0_i32 = arith.constant 0 : i32
    %0 = arith.cmpi eq, %arg1, %c0_i32 : i32
    %1 = arith.extui %0 : i1 to i32
    %c0_i32_0 = arith.constant 0 : i32
    %2 = arith.cmpi ne, %1, %c0_i32_0 : i32
    scf.if %2 {
      %cst_18 = arith.constant 0.000000e+00 : f32
      %45 = vector.broadcast %cst_18 : f32 to vector<8x128xf32>
      %c0_19 = arith.constant 0 : index
      %c0_20 = arith.constant 0 : index
      %46 = vector.load %arg5[%c0_19, %c0_20] : memref<8x128xf32, #tpu.memory_space<vmem>>, vector<8x128xf32>
      tpu.vector_store %arg5[%c0_19, %c0_20], %45 {strides = array<i32>} : memref<8x128xf32, #tpu.memory_space<vmem>>, vector<8x128xf32>,
    } else {
    }
    %c0 = arith.constant 0 : index
    %c0_1 = arith.constant 0 : index
    %3 = vector.load %arg2[%c0, %c0_1] : memref<16x128xf32, #tpu.memory_space<vmem>>, vector<16x128xf32>
    %c0_2 = arith.constant 0 : index
    %c0_3 = arith.constant 0 : index
    %4 = vector.load %arg3[%c0_2, %c0_3] : memref<16x128xi8, #tpu.memory_space<vmem>>, vector<16x128xi8>
    %5 = arith.extsi %4 : vector<16x128xi8> to vector<16x128xi32>
    %c1_i32 = arith.constant 1 : i32
    %6 = vector.broadcast %c1_i32 : i32 to vector<16x128xi32>
    %7 = arith.cmpi eq, %5, %6 : vector<16x128xi32>
    %cst = arith.constant 0.000000e+00 : f32
    %8 = vector.broadcast %cst : f32 to vector<16x128xf32>
    %9 = arith.subf %8, %3 : vector<16x128xf32>
    %10 = arith.minimumf %3, %9 : vector<16x128xf32>
    %11 = math.exp %10 : vector<16x128xf32>
    %12 = arith.select %7, %9, %3 : vector<16x128xi1>, vector<16x128xf32>
    %cst_4 = arith.constant 0.000000e+00 : f32
    %13 = vector.broadcast %cst_4 : f32 to vector<16x128xf32>
    %14 = arith.maximumf %12, %13 : vector<16x128xf32>
    %15 = math.log1p %11 : vector<16x128xf32>
    %16 = arith.addf %14, %15 : vector<16x128xf32>
    %cst_5 = arith.constant 1.000000e+00 : f32
    %17 = vector.broadcast %cst_5 : f32 to vector<16x128xf32>
    %18 = arith.addf %17, %11 : vector<16x128xf32>
    %19 = tpu.reciprocal %18 : vector<16x128xf32> -> vector<16x128xf32>
    %20 = arith.select %7, %3, %9 : vector<16x128xi1>, vector<16x128xf32>
    %cst_6 = arith.constant 0.000000e+00 : f32
    %21 = vector.broadcast %cst_6 : f32 to vector<16x128xf32>
    %22 = arith.cmpf oge, %20, %21 : vector<16x128xf32>
    %cst_7 = arith.constant 1.000000e+00 : f32
    %23 = vector.broadcast %cst_7 : f32 to vector<16x128xf32>
    %24 = arith.select %22, %11, %23 : vector<16x128xi1>, vector<16x128xf32>
    %25 = arith.mulf %24, %19 : vector<16x128xf32>
    %cst_8 = arith.constant 2.500000e-01 : f32
    %cst_9 = arith.constant 7.500000e-01 : f32
    %26 = vector.broadcast %cst_8 : f32 to vector<16x128xf32>
    %27 = vector.broadcast %cst_9 : f32 to vector<16x128xf32>
    %28 = arith.select %7, %26, %27 : vector<16x128xi1>, vector<16x128xf32>
    %29 = arith.mulf %25, %25 : vector<16x128xf32>
    %30 = arith.mulf %28, %29 : vector<16x128xf32>
    %31 = arith.mulf %30, %16 : vector<16x128xf32>
    %c1_i32_10 = arith.constant 1 : i32
    %32 = arith.muli %arg0, %c1_i32_10 : i32
    %33 = arith.addi %32, %arg1 : i32
    %c2048_i32 = arith.constant 2048 : i32
    %34 = arith.muli %33, %c2048_i32 : i32
    %c2048_i32_11 = arith.constant 2048 : i32
    %35 = arith.addi %34, %c2048_i32_11 : i32
    %c2048_i32_12 = arith.constant 2048 : i32
    %36 = arith.cmpi sle, %35, %c2048_i32_12 : i32
    %37 = arith.extui %36 : i1 to i32
    %c0_i32_13 = arith.constant 0 : i32
    %38 = arith.cmpi ne, %37, %c0_i32_13 : i32
    scf.if %38 {
      %c0_18 = arith.constant 0 : index
      %c0_19 = arith.constant 0 : index
      %45 = vector.load %arg5[%c0_18, %c0_19] : memref<8x128xf32, #tpu.memory_space<vmem>>, vector<1x128xf32>
      %cst_20 = arith.constant dense<0.000000e+00> : vector<128xf32>
      %46 = vector.multi_reduction <add>, %31, %cst_20 [0] : vector<16x128xf32> to vector<128xf32>
      %47 = vector.shape_cast %46 : vector<128xf32> to vector<1x128xf32>
      %48 = arith.addf %45, %47 : vector<1x128xf32>
      %c0_21 = arith.constant 0 : index
      %c0_22 = arith.constant 0 : index
      %49 = vector.load %arg5[%c0_21, %c0_22] : memref<8x128xf32, #tpu.memory_space<vmem>>, vector<1x128xf32>
      tpu.vector_store %arg5[%c0_21, %c0_22], %48 {strides = array<i32>} : memref<8x128xf32, #tpu.memory_space<vmem>>, vector<1x128xf32>,
    } else {
    }
    %c2048_i32_14 = arith.constant 2048 : i32
    %39 = arith.cmpi sgt, %35, %c2048_i32_14 : i32
    %40 = arith.extui %39 : i1 to i32
    %c0_i32_15 = arith.constant 0 : i32
    %41 = arith.cmpi ne, %40, %c0_i32_15 : i32
    scf.if %41 {
      %45 = tpu.iota {dimensions = array<i32: 0>} : vector<16x128xi32>
      %46 = tpu.iota {dimensions = array<i32: 1>} : vector<16x128xi32>
      %c128_i32 = arith.constant 128 : i32
      %47 = vector.broadcast %c128_i32 : i32 to vector<16x128xi32>
      %48 = arith.muli %45, %47 : vector<16x128xi32>
      %49 = vector.broadcast %34 : i32 to vector<16x128xi32>
      %50 = arith.addi %49, %48 : vector<16x128xi32>
      %51 = arith.addi %50, %46 : vector<16x128xi32>
      %c2048_i32_18 = arith.constant 2048 : i32
      %52 = vector.broadcast %c2048_i32_18 : i32 to vector<16x128xi32>
      %53 = arith.cmpi slt, %51, %52 : vector<16x128xi32>
      %cst_19 = arith.constant 0.000000e+00 : f32
      %54 = vector.broadcast %cst_19 : f32 to vector<16x128xf32>
      %55 = arith.select %53, %31, %54 : vector<16x128xi1>, vector<16x128xf32>
      %c0_20 = arith.constant 0 : index
      %c0_21 = arith.constant 0 : index
      %56 = vector.load %arg5[%c0_20, %c0_21] : memref<8x128xf32, #tpu.memory_space<vmem>>, vector<1x128xf32>
      %cst_22 = arith.constant dense<0.000000e+00> : vector<128xf32>
      %57 = vector.multi_reduction <add>, %55, %cst_22 [0] : vector<16x128xf32> to vector<128xf32>
      %58 = vector.shape_cast %57 : vector<128xf32> to vector<1x128xf32>
      %59 = arith.addf %56, %58 : vector<1x128xf32>
      %c0_23 = arith.constant 0 : index
      %c0_24 = arith.constant 0 : index
      %60 = vector.load %arg5[%c0_23, %c0_24] : memref<8x128xf32, #tpu.memory_space<vmem>>, vector<1x128xf32>
      tpu.vector_store %arg5[%c0_23, %c0_24], %59 {strides = array<i32>} : memref<8x128xf32, #tpu.memory_space<vmem>>, vector<1x128xf32>,
    } else {
    }
    %c0_i32_16 = arith.constant 0 : i32
    %42 = arith.cmpi eq, %arg1, %c0_i32_16 : i32
    %43 = arith.extui %42 : i1 to i32
    %c0_i32_17 = arith.constant 0 : i32
    %44 = arith.cmpi ne, %43, %c0_i32_17 : i32
    scf.if %44 {
      %c0_18 = arith.constant 0 : index
      %c0_19 = arith.constant 0 : index
      %45 = vector.load %arg5[%c0_18, %c0_19] : memref<8x128xf32, #tpu.memory_space<vmem>>, vector<8x128xf32>
      %c0_20 = arith.constant 0 : index
      %c0_21 = arith.constant 0 : index
      %46 = vector.load %arg4[%c0_20, %c0_21] : memref<8x128xf32, #tpu.memory_space<vmem>>, vector<8x128xf32>
      tpu.vector_store %arg4[%c0_20, %c0_21], %45 {strides = array<i32>} : memref<8x128xf32, #tpu.memory_space<vmem>>, vector<8x128xf32>,
    } else {
    }
    return
  }
  func.func @transform_0(%arg0: i32, %arg1: i32) -> (i32, i32) {
    %c1_i32 = arith.constant 1 : i32
    %0 = arith.muli %arg0, %c1_i32 : i32
    %1 = arith.addi %0, %arg1 : i32
    %c0_i32 = arith.constant 0 : i32
    %2 = arith.minsi %1, %c0_i32 : i32
    %c0_i32_0 = arith.constant 0 : i32
    %c0_i32_1 = arith.constant 0 : i32
    return %2, %c0_i32_0 : i32, i32
  }
  func.func @transform_1(%arg0: i32, %arg1: i32) -> (i32, i32) {
    %c1_i32 = arith.constant 1 : i32
    %0 = arith.muli %arg0, %c1_i32 : i32
    %1 = arith.addi %0, %arg1 : i32
    %c0_i32 = arith.constant 0 : i32
    %2 = arith.minsi %1, %c0_i32 : i32
    %c0_i32_0 = arith.constant 0 : i32
    %c0_i32_1 = arith.constant 0 : i32
    return %2, %c0_i32_0 : i32, i32
  }
  func.func @transform_2(%arg0: i32, %arg1: i32) -> (i32, i32) {
    %c0_i32 = arith.constant 0 : i32
    %c0_i32_0 = arith.constant 0 : i32
    return %arg0, %c0_i32 : i32, i32
  }
}

</mosaic_0001>

<bundles_post_ra>
// kernel: tpu_custom_call.1
= control target key start
LH: loop header
LB: loop body
LE: loop exit
PB: predicated region body
PF: predicated region fallthrough
CT: control target
= control target key end

     0   :  { %7 = vsyncpa [#allocation4], 0  ;;  %s392_s0 = inlined_call_operand.hbm [shape: f32[16,128], index: 0, kind: input, shape index: {}]   ;;  %s393_s1 = inlined_call_operand.hbm [shape: s8[16,128], index: 1, kind: input, shape index: {}]   ;;  %s394_s2 = inlined_call_operand.hbm [shape: f32[8,128], index: 2, kind: output, shape index: {}]  }
   0x1   :  { %8 = vsyncpa [#allocation7], 0 }
   0x2   :  { %9 = vsyncpa [#allocation5], 0  ;;  %s294_s9 = smov [#allocation3]   ;;  %s222_s13 = scalar_lea.hbm %s392_s0, 256 }
   0x3   :  { %s21_s10 = sshll.u32 %s294_s9, 4  ;;  %p223_p0 = scmp.ne.s32.totalorder %s392_s0, %s222_s13  ;;  %s22_s10 = int_to_ptr.vmem [resolvable:$true] %s21_s10 }
   0x4   :  { %p226_p1 = scmp.lt.u32.totalorder %s222_s13, %s392_s0 }
   0x6   :  { %p228_p2 = pnand %p226_p1, %p223_p0 }
   0x8   :  { %231 = shalt.err (!%p228_p2)
}
   0x9   :  { %s232_s18 = scalar_lea.vmem %s22_s10, 256  ;;  %p237_p4 = scmp.lt.s32.totalorder %s22_s10, %s22_s10 }
   0xa   :  { %p233_p3 = scmp.ne.s32.totalorder %s22_s10, %s232_s18  ;;  %p238_p5 = scmp.lt.s32.totalorder %s232_s18, %s232_s18 }
   0xc   :  { %p239_p6 = por %p238_p5, %p237_p4 }
   0xe   :  { %p240_p7 = pnand %p239_p6, %p233_p3 }
  0x10   :  { %243 = shalt.err (!%p240_p7)
}
  0x11   :  { %s295_s19 = smov 128   ;;  %s296_s20 = smov 8  }
  0x12   :  { %27 = dma.hbm_to_vmem [thread:$0]  %s392_s0, 256, %s22_s10, [#allocation4], %s295_s19, %s295_s19, %s296_s20  }
  0x13   :  { %s297_s23 = smov [#allocation6]   ;;  %s244_s27 = scalar_lea.hbm %s393_s1, 64 }
  0x14   :  { %s39_s24 = sshll.u32 %s297_s23, 4  ;;  %p245_p8 = scmp.ne.s32.totalorder %s393_s1, %s244_s27  ;;  %s40_s24 = int_to_ptr.vmem [resolvable:$true] %s39_s24 }
  0x15   :  { %p248_p9 = scmp.lt.u32.totalorder %s244_s27, %s393_s1 }
  0x17   :  { %p250_p10 = pnand %p248_p9, %p245_p8 }
  0x19   :  { %253 = shalt.err (!%p250_p10)
}
  0x1a   :  { %s254_s4 = scalar_lea.vmem %s40_s24, 64  ;;  %p259_p12 = scmp.lt.s32.totalorder %s40_s24, %s40_s24 }
  0x1b   :  { %p255_p11 = scmp.ne.s32.totalorder %s40_s24, %s254_s4  ;;  %p260_p13 = scmp.lt.s32.totalorder %s254_s4, %s254_s4 }
  0x1d   :  { %p261_p0 = por %p260_p13, %p259_p12 }
  0x1f   :  { %p262_p1 = pnand %p261_p0, %p255_p11 }
  0x21   :  { %265 = shalt.err (!%p262_p1)
}
  0x22   :  { %s298_s0 = smov 32   ;;  %s299_s5 = smov 2  }
  0x23   :  { %45 = dma.hbm_to_vmem [thread:$0]  %s393_s1, 64, %s40_s24, [#allocation7], %s298_s0, %s298_s0, %s299_s5  }
  0x24   :  { %288 = dma.done.wait [#allocation4], 256  }
  0x25   :  { %289 = vsyncadd [#allocation4], 4294967040 }
  0x26   :  { %290 = dma.done.wait [#allocation7], 64  }
  0x27   :  { %291 = vsyncadd [#allocation7], 4294967232  ;;  %v300_v0 = vmov 0.0   ;;  %v65_v1 = vld [vmem:[#allocation3] sm:$0xff]  ;;  %v66_v2 = vld [vmem:[#allocation3 + $0x8] sm:$0xff]  ;;  %v301_v47 = vmov 0.75  }
  0x28   :  { %64 = vst [vmem:[#allocation2] sm:$0xff] %v300_v0  ;;  %v73_v3 = vsub.f32 0.0, %v65_v1  ;;  %v74_v4 = vsub.f32 0.0, %v66_v2  ;;  %v198_v9 = vld [vmem:[#allocation6] sm:$0xf]   ;;  %s302_s1 = smov [#allocation8]  }
  0x29   :  { %v199_v11 = vunpack.c.0.s8 %v198_v9  ;;  %v200_v13 = vunpack.c.1.s8 %v198_v9  ;;  %s183_s8 = sshll.u32 %s302_s1, 4  ;;  %s184_s8 = int_to_ptr.vmem [resolvable:$true] %s183_s8 }
  0x2a   :  { %v75_v5 = vmin.f32 %v65_v1, %v73_v3  ;;  %v76_v6 = vmin.f32 %v66_v2, %v74_v4  ;;  %s266_s9 = scalar_lea.vmem %s184_s8, 128  ;;  %p271_p3 = scmp.lt.s32.totalorder %s184_s8, %s184_s8 }
  0x2b   :  { %vm342_vm0 = vcmp.eq.s32.totalorder %v199_v11, 1  ;;  %vm346_vm1 = vcmp.eq.s32.totalorder %v200_v13, 1  ;;  %p267_p2 = scmp.ne.s32.totalorder %s184_s8, %s266_s9  ;;  %p272_p4 = scmp.lt.s32.totalorder %s266_s9, %s266_s9 }
  0x2c   :  { %v77_v7 = vmul.f32 1.442695, %v75_v5  ;;  %v79_v8 = vmul.f32 1.442695, %v76_v6  ;;  %v109_v20 = vsel %vm342_vm0, %v65_v1, %v73_v3  ;;  %v110_v22 = vsel %vm346_vm1, %v66_v2, %v74_v4 }
  0x2d   :  { %vm354_vm2 = vcmp.ge.f32.partialorder %v109_v20, 0.0  ;;  %v81_v27 = vsel %vm342_vm0, %v73_v3, %v65_v1  ;;  %vm360_vm3 = vcmp.ge.f32.partialorder %v110_v22, 0.0  ;;  %v82_v29 = vsel %vm346_vm1, %v74_v4, %v66_v2  ;;  %p273_p5 = por %p272_p4, %p271_p3 }
  0x2e   :  { %210 = vpow2.f32 %v77_v7  ;;  %v83_v36 = vmax.f32 %v81_v27, 0.0  ;;  %v84_v40 = vmax.f32 %v82_v29, 0.0  ;;  %v117_v48 = vsel %vm342_vm0, 0.25, %v301_v47 }
  0x2f   :  { %212 = vpow2.f32 %v79_v8  ;;  %v118_v50 = vsel %vm346_vm1, 0.25, %v301_v47  ;;  %v132_v0 = vld [vmem:[#allocation2] sm:$0x1]  ;;  %p274_p6 = pnand %p273_p5, %p267_p2 }
  0x38   :  { %v211_v10 = vpop.eup %210 }
  0x39   :  { %v213_v12 = vpop.eup %212  ;;  %v85_v14 = vadd.f32 1.0, %v211_v10  ;;  %v88_v17 = vmul.f32 -0.5, %v211_v10  ;;  %v91_v23 = vand.u32 2147483647, %v211_v10  ;;  %v113_v34 = vsel %vm354_vm2, %v211_v10, 1.0 }
  0x3a   :  { %v94_v15 = vadd.f32 1.0, %v213_v12  ;;  %v97_v19 = vmul.f32 -0.5, %v213_v12  ;;  %v100_v25 = vand.u32 2147483647, %v213_v12  ;;  %v114_v38 = vsel %vm360_vm3, %v213_v12, 1.0 }
  0x3b   :  { %214 = vlog2.f32 %v85_v14  ;;  %v89_v21 = vadd.f32 1.0, %v88_v17  ;;  %vm366_vm4 = vcmp.lt.f32.partialorder %v91_v23, 0.0004427343 }
  0x3c   :  { %216 = vlog2.f32 %v94_v15  ;;  %v98_v24 = vadd.f32 1.0, %v97_v19  ;;  %vm101_vm5 = vcmp.lt.f32.partialorder %v100_v25, 0.0004427343 }
  0x3d   :  { %218 = vrcp.f32 %v85_v14  ;;  %v90_v30 = vmul.f32 %v211_v10, %v89_v21 }
  0x3e   :  { %220 = vrcp.f32 %v94_v15  ;;  %v99_v33 = vmul.f32 %v213_v12, %v98_v24 }
  0x45   :  { %v215_v31 = vpop.eup %214 }
  0x46   :  { %v217_v35 = vpop.eup %216  ;;  %v87_v37 = vmul.f32 0.6931472, %v215_v31 }
  0x47   :  { %v219_v39 = vpop.eup %218  ;;  %v96_v41 = vmul.f32 0.6931472, %v217_v35 }
  0x48   :  { %v221_v42 = vpop.eup %220  ;;  %v93_v43 = vsel %vm366_vm4, %v90_v30, %v87_v37  ;;  %v115_v44 = vmul.f32 %v219_v39, %v113_v34 }
  0x49   :  { %v102_v45 = vsel %vm101_vm5, %v99_v33, %v96_v41  ;;  %v116_v46 = vmul.f32 %v221_v42, %v114_v38  ;;  %v103_v49 = vadd.f32 %v93_v43, %v83_v36 }
  0x4a   :  { %v119_v51 = vmul.f32 %v115_v44, %v115_v44  ;;  %v104_v52 = vadd.f32 %v102_v45, %v84_v40 }
  0x4b   :  { %v120_v53 = vmul.f32 %v116_v46, %v116_v46 }
  0x4c   :  { %v121_v54 = vmul.f32 %v119_v51, %v117_v48 }
  0x4d   :  { %v122_v55 = vmul.f32 %v120_v53, %v118_v50 }
  0x4e   :  { %v123_v56 = vmul.f32 %v121_v54, %v103_v49 }
  0x4f   :  { %v124_v57 = vmul.f32 %v122_v55, %v104_v52 }
  0x51   :  { %v133_v58 = vadd.f32 %v124_v57, %v123_v56 }
  0x53   :  { %v134_v59 = vrot.slane %v133_v58, 4 }
  0x55   :  { %v135_v60 = vadd.f32 %v134_v59, %v133_v58 }
  0x57   :  { %v136_v61 = vrot.slane %v135_v60, 2 }
  0x59   :  { %v137_v62 = vadd.f32 %v136_v61, %v135_v60 }
  0x5b   :  { %v138_v63 = vrot.slane %v137_v62, 1 }
  0x5d   :  { %v139_v1 = vadd.f32 %v138_v63, %v137_v62 }
  0x5f   :  { %v140_v2 = vadd.f32 %v139_v1, %v132_v0 }
  0x61   :  { %141 = vst [vmem:[#allocation2] sm:$0x1] %v140_v2 }
  0x68   :  { %v175_v3 = vld [vmem:[#allocation2] sm:$0xff] }
  0x69   :  { %176 = vst [vmem:[#allocation8] sm:$0xff] %v175_v3 }
  0x6a   :  { %277 = shalt.err (!%p274_p6)
}
  0x6b   :  { %s278_s12 = scalar_lea.hbm %s394_s2, 128 }
  0x6c   :  { %p279_p7 = scmp.ne.s32.totalorder %s394_s2, %s278_s12  ;;  %p282_p8 = scmp.lt.u32.totalorder %s278_s12, %s394_s2 }
  0x6e   :  { %p284_p9 = pnand %p282_p8, %p279_p7 }
  0x70   :  { %287 = shalt.err (!%p284_p9)
}
  0x71   :  { %186 = dma.vmem_to_hbm [thread:$0]  %s184_s8, 128, %s394_s2, [#allocation5]  }
  0x72   :  { %292 = dma.done.wait [#allocation5], 128  }
  0x73   :  { %293 = vsyncadd [#allocation5], 4294967168 }
  0x74   :  { %190 = vsyncpa [#allocation4], 1 }
  0x75   :  { %191 = vsyncpa [#allocation7], 1 }
  0x76   :  { %192 = vsyncpa [#allocation5], 1 }

// kernel: tpu_custom_call.1
= control target key start
LH: loop header
LB: loop body
LE: loop exit
PB: predicated region body
PF: predicated region fallthrough
CT: control target
= control target key end

     0   :  { %7 = vsyncpa [#allocation4], 0  ;;  %s392_s0 = inlined_call_operand.hbm [shape: f32[16,128], index: 0, kind: input, shape index: {}]   ;;  %s393_s1 = inlined_call_operand.hbm [shape: s8[16,128], index: 1, kind: input, shape index: {}]   ;;  %s394_s2 = inlined_call_operand.hbm [shape: f32[8,128], index: 2, kind: output, shape index: {}]  }
   0x1   :  { %8 = vsyncpa [#allocation7], 0 }
   0x2   :  { %9 = vsyncpa [#allocation5], 0  ;;  %s294_s9 = smov [#allocation3]   ;;  %s222_s13 = scalar_lea.hbm %s392_s0, 256 }
   0x3   :  { %s21_s10 = sshll.u32 %s294_s9, 4  ;;  %p223_p0 = scmp.ne.s32.totalorder %s392_s0, %s222_s13  ;;  %s22_s10 = int_to_ptr.vmem [resolvable:$true] %s21_s10 }
   0x4   :  { %p226_p1 = scmp.lt.u32.totalorder %s222_s13, %s392_s0 }
   0x6   :  { %p228_p2 = pnand %p226_p1, %p223_p0 }
   0x8   :  { %231 = shalt.err (!%p228_p2)
}
   0x9   :  { %s232_s18 = scalar_lea.vmem %s22_s10, 256  ;;  %p237_p4 = scmp.lt.s32.totalorder %s22_s10, %s22_s10 }
   0xa   :  { %p233_p3 = scmp.ne.s32.totalorder %s22_s10, %s232_s18  ;;  %p238_p5 = scmp.lt.s32.totalorder %s232_s18, %s232_s18 }
   0xc   :  { %p239_p6 = por %p238_p5, %p237_p4 }
   0xe   :  { %p240_p7 = pnand %p239_p6, %p233_p3 }
  0x10   :  { %243 = shalt.err (!%p240_p7)
}
  0x11   :  { %s295_s19 = smov 128   ;;  %s296_s20 = smov 8  }
  0x12   :  { %27 = dma.hbm_to_vmem [thread:$0]  %s392_s0, 256, %s22_s10, [#allocation4], %s295_s19, %s295_s19, %s296_s20  }
  0x13   :  { %s297_s23 = smov [#allocation6]   ;;  %s244_s27 = scalar_lea.hbm %s393_s1, 64 }
  0x14   :  { %s39_s24 = sshll.u32 %s297_s23, 4  ;;  %p245_p8 = scmp.ne.s32.totalorder %s393_s1, %s244_s27  ;;  %s40_s24 = int_to_ptr.vmem [resolvable:$true] %s39_s24 }
  0x15   :  { %p248_p9 = scmp.lt.u32.totalorder %s244_s27, %s393_s1 }
  0x17   :  { %p250_p10 = pnand %p248_p9, %p245_p8 }
  0x19   :  { %253 = shalt.err (!%p250_p10)
}
  0x1a   :  { %s254_s4 = scalar_lea.vmem %s40_s24, 64  ;;  %p259_p12 = scmp.lt.s32.totalorder %s40_s24, %s40_s24 }
  0x1b   :  { %p255_p11 = scmp.ne.s32.totalorder %s40_s24, %s254_s4  ;;  %p260_p13 = scmp.lt.s32.totalorder %s254_s4, %s254_s4 }
  0x1d   :  { %p261_p0 = por %p260_p13, %p259_p12 }
  0x1f   :  { %p262_p1 = pnand %p261_p0, %p255_p11 }
  0x21   :  { %265 = shalt.err (!%p262_p1)
}
  0x22   :  { %s298_s0 = smov 32   ;;  %s299_s5 = smov 2  }
  0x23   :  { %45 = dma.hbm_to_vmem [thread:$0]  %s393_s1, 64, %s40_s24, [#allocation7], %s298_s0, %s298_s0, %s299_s5  }
  0x24   :  { %288 = dma.done.wait [#allocation4], 256  }
  0x25   :  { %289 = vsyncadd [#allocation4], 4294967040 }
  0x26   :  { %290 = dma.done.wait [#allocation7], 64  }
  0x27   :  { %291 = vsyncadd [#allocation7], 4294967232  ;;  %v300_v0 = vmov 0.0   ;;  %v65_v1 = vld [vmem:[#allocation3] sm:$0xff]  ;;  %v66_v2 = vld [vmem:[#allocation3 + $0x8] sm:$0xff]  ;;  %v301_v47 = vmov 0.75  }
  0x28   :  { %64 = vst [vmem:[#allocation2] sm:$0xff] %v300_v0  ;;  %v73_v3 = vsub.f32 0.0, %v65_v1  ;;  %v74_v4 = vsub.f32 0.0, %v66_v2  ;;  %v198_v9 = vld [vmem:[#allocation6] sm:$0xf]   ;;  %s302_s1 = smov [#allocation8]  }
  0x29   :  { %v199_v11 = vunpack.c.0.s8 %v198_v9  ;;  %v200_v13 = vunpack.c.1.s8 %v198_v9  ;;  %s183_s8 = sshll.u32 %s302_s1, 4  ;;  %s184_s8 = int_to_ptr.vmem [resolvable:$true] %s183_s8 }
  0x2a   :  { %v75_v5 = vmin.f32 %v65_v1, %v73_v3  ;;  %v76_v6 = vmin.f32 %v66_v2, %v74_v4  ;;  %s266_s9 = scalar_lea.vmem %s184_s8, 128  ;;  %p271_p3 = scmp.lt.s32.totalorder %s184_s8, %s184_s8 }
  0x2b   :  { %vm342_vm0 = vcmp.eq.s32.totalorder %v199_v11, 1  ;;  %vm346_vm1 = vcmp.eq.s32.totalorder %v200_v13, 1  ;;  %p267_p2 = scmp.ne.s32.totalorder %s184_s8, %s266_s9  ;;  %p272_p4 = scmp.lt.s32.totalorder %s266_s9, %s266_s9 }
  0x2c   :  { %v77_v7 = vmul.f32 1.442695, %v75_v5  ;;  %v79_v8 = vmul.f32 1.442695, %v76_v6  ;;  %v109_v20 = vsel %vm342_vm0, %v65_v1, %v73_v3  ;;  %v110_v22 = vsel %vm346_vm1, %v66_v2, %v74_v4 }
  0x2d   :  { %vm354_vm2 = vcmp.ge.f32.partialorder %v109_v20, 0.0  ;;  %v81_v27 = vsel %vm342_vm0, %v73_v3, %v65_v1  ;;  %vm360_vm3 = vcmp.ge.f32.partialorder %v110_v22, 0.0  ;;  %v82_v29 = vsel %vm346_vm1, %v74_v4, %v66_v2  ;;  %p273_p5 = por %p272_p4, %p271_p3 }
  0x2e   :  { %210 = vpow2.f32 %v77_v7  ;;  %v83_v36 = vmax.f32 %v81_v27, 0.0  ;;  %v84_v40 = vmax.f32 %v82_v29, 0.0  ;;  %v117_v48 = vsel %vm342_vm0, 0.25, %v301_v47 }
  0x2f   :  { %212 = vpow2.f32 %v79_v8  ;;  %v118_v50 = vsel %vm346_vm1, 0.25, %v301_v47  ;;  %v132_v0 = vld [vmem:[#allocation2] sm:$0x1]  ;;  %p274_p6 = pnand %p273_p5, %p267_p2 }
  0x38   :  { %v211_v10 = vpop.eup %210 }
  0x39   :  { %v213_v12 = vpop.eup %212  ;;  %v85_v14 = vadd.f32 1.0, %v211_v10  ;;  %v88_v17 = vmul.f32 -0.5, %v211_v10  ;;  %v91_v23 = vand.u32 2147483647, %v211_v10  ;;  %v113_v34 = vsel %vm354_vm2, %v211_v10, 1.0 }
  0x3a   :  { %v94_v15 = vadd.f32 1.0, %v213_v12  ;;  %v97_v19 = vmul.f32 -0.5, %v213_v12  ;;  %v100_v25 = vand.u32 2147483647, %v213_v12  ;;  %v114_v38 = vsel %vm360_vm3, %v213_v12, 1.0 }
  0x3b   :  { %214 = vlog2.f32 %v85_v14  ;;  %v89_v21 = vadd.f32 1.0, %v88_v17  ;;  %vm366_vm4 = vcmp.lt.f32.partialorder %v91_v23, 0.0004427343 }
  0x3c   :  { %216 = vlog2.f32 %v94_v15  ;;  %v98_v24 = vadd.f32 1.0, %v97_v19  ;;  %vm101_vm5 = vcmp.lt.f32.partialorder %v100_v25, 0.0004427343 }
  0x3d   :  { %218 = vrcp.f32 %v85_v14  ;;  %v90_v30 = vmul.f32 %v211_v10, %v89_v21 }
  0x3e   :  { %220 = vrcp.f32 %v94_v15  ;;  %v99_v33 = vmul.f32 %v213_v12, %v98_v24 }
  0x45   :  { %v215_v31 = vpop.eup %214 }
  0x46   :  { %v217_v35 = vpop.eup %216  ;;  %v87_v37 = vmul.f32 0.6931472, %v215_v31 }
  0x47   :  { %v219_v39 = vpop.eup %218  ;;  %v96_v41 = vmul.f32 0.6931472, %v217_v35 }
  0x48   :  { %v221_v42 = vpop.eup %220  ;;  %v93_v43 = vsel %vm366_vm4, %v90_v30, %v87_v37  ;;  %v115_v44 = vmul.f32 %v219_v39, %v113_v34 }
  0x49   :  { %v102_v45 = vsel %vm101_vm5, %v99_v33, %v96_v41  ;;  %v116_v46 = vmul.f32 %v221_v42, %v114_v38  ;;  %v103_v49 = vadd.f32 %v93_v43, %v83_v36 }
  0x4a   :  { %v119_v51 = vmul.f32 %v115_v44, %v115_v44  ;;  %v104_v52 = vadd.f32 %v102_v45, %v84_v40 }
  0x4b   :  { %v120_v53 = vmul.f32 %v116_v46, %v116_v46 }
  0x4c   :  { %v121_v54 = vmul.f32 %v119_v51, %v117_v48 }
  0x4d   :  { %v122_v55 = vmul.f32 %v120_v53, %v118_v50 }
  0x4e   :  { %v123_v56 = vmul.f32 %v121_v54, %v103_v49 }
  0x4f   :  { %v124_v57 = vmul.f32 %v122_v55, %v104_v52 }
  0x51   :  { %v133_v58 = vadd.f32 %v124_v57, %v123_v56 }
  0x53   :  { %v134_v59 = vrot.slane %v133_v58, 4 }
  0x55   :  { %v135_v60 = vadd.f32 %v134_v59, %v133_v58 }
  0x57   :  { %v136_v61 = vrot.slane %v135_v60, 2 }
  0x59   :  { %v137_v62 = vadd.f32 %v136_v61, %v135_v60 }
  0x5b   :  { %v138_v63 = vrot.slane %v137_v62, 1 }
  0x5d   :  { %v139_v1 = vadd.f32 %v138_v63, %v137_v62 }
  0x5f   :  { %v140_v2 = vadd.f32 %v139_v1, %v132_v0 }
  0x61   :  { %141 = vst [vmem:[#allocation2] sm:$0x1] %v140_v2 }
  0x68   :  { %v175_v3 = vld [vmem:[#allocation2] sm:$0xff] }
  0x69   :  { %176 = vst [vmem:[#allocation8] sm:$0xff] %v175_v3 }
  0x6a   :  { %277 = shalt.err (!%p274_p6)
}
  0x6b   :  { %s278_s12 = scalar_lea.hbm %s394_s2, 128 }
  0x6c   :  { %p279_p7 = scmp.ne.s32.totalorder %s394_s2, %s278_s12  ;;  %p282_p8 = scmp.lt.u32.totalorder %s278_s12, %s394_s2 }
  0x6e   :  { %p284_p9 = pnand %p282_p8, %p279_p7 }
  0x70   :  { %287 = shalt.err (!%p284_p9)
}
  0x71   :  { %186 = dma.vmem_to_hbm [thread:$0]  %s184_s8, 128, %s394_s2, [#allocation5]  }
  0x72   :  { %292 = dma.done.wait [#allocation5], 128  }
  0x73   :  { %293 = vsyncadd [#allocation5], 4294967168 }
  0x74   :  { %190 = vsyncpa [#allocation4], 1 }
  0x75   :  { %191 = vsyncpa [#allocation7], 1 }
  0x76   :  { %192 = vsyncpa [#allocation5], 1 }

</bundles_post_ra>
